<compile_context>
chip_gen: v7x
topology: tpu7x:2x2x1
jax: 0.10.0
libtpu: 0.0.40
codegen_flags: <defaults>
</compile_context>

<pallas_src>
import jax
import jax.numpy as jnp
from jax.experimental import pallas as pl
from jax.experimental.pallas import tpu as pltpu

_BN_EPS = 1e-5  # PyTorch BatchNorm2d default


def _conv1x1_vpu(w, x):
    """(Cout,Cin) @ (Cin,L) as an unrolled VPU MAC (Cin/Cout tiny; skip MXU)."""
    cin = w.shape[1]
    acc = w[:, 0:1] * x[0:1, :]
    for i in range(1, cin):
        acc = acc + w[:, i:i + 1] * x[i:i + 1, :]
    return acc


def _stats_kernel(w_ref, x_ref, sum_ref, ssq_ref):
    # w_ref: (Cout, Cin); x_ref: (Cin, L)  (batch dim squeezed by BlockSpec)
    # sum_ref / ssq_ref: (Cout, 1) accumulators resident across the whole grid.
    @pl.when(jnp.logical_and(pl.program_id(0) == 0, pl.program_id(1) == 0))
    def _init():
        sum_ref[...] = jnp.zeros_like(sum_ref)
        ssq_ref[...] = jnp.zeros_like(ssq_ref)

    y = _conv1x1_vpu(w_ref[...], x_ref[...])            # (Cout, L)
    sum_ref[...] += jnp.sum(y, axis=1, keepdims=True)
    ssq_ref[...] += jnp.sum(y * y, axis=1, keepdims=True)


def _apply_kernel(wb_ref, x_ref, o_ref):
    # wb_ref: (Cout, Cin+1) = [BN-scale-folded weight | shift]; x_ref: (Cin, L)
    cin = x_ref.shape[0]
    wb = wb_ref[...]
    z = _conv1x1_vpu(wb[:, :cin], x_ref[...]) + wb[:, cin:cin + 1]
    o_ref[...] = jnp.maximum(z, 0.0)                    # ReLU


def _pick_tile(hw, max_tile=512):
    """Largest multiple-of-128 divisor of hw that is <= max_tile, else hw."""
    if hw % 128 == 0:
        t = (max_tile // 128) * 128
        while t >= 128:
            if hw % t == 0:
                return t
            t -= 128
    return hw  # full-extent block (always legal)


def base_conv_block(x, conv_weight, conv_bias, bn_gamma, bn_beta):
    """x: (N, Cin, H, W) f32; conv_weight: (Cout, Cin, 1, 1).

    Matches nn.Sequential(Conv2d(Cin,Cout,1,1), BatchNorm2d(Cout), ReLU())
    forward in training mode (batch statistics).  conv_bias is accepted but
    unused: training-mode BatchNorm cancels it exactly.
    """
    N, Cin, H, W = x.shape
    Cout = conv_weight.shape[0]
    HW = H * W
    L = _pick_tile(HW)
    T = HW // L

    x3 = x.reshape(N, Cin, HW).astype(jnp.float32)      # NCHW kept, no transpose
    w = conv_weight.reshape(Cout, Cin).astype(jnp.float32)

    # Pass 1: per-channel sum and sum-of-squares of the conv output over N*H*W.
    s, ssq = pl.pallas_call(
        _stats_kernel,
        out_shape=(jax.ShapeDtypeStruct((Cout, 1), jnp.float32),
                   jax.ShapeDtypeStruct((Cout, 1), jnp.float32)),
        grid=(N, T),
        in_specs=[
            pl.BlockSpec((Cout, Cin), lambda n, t: (0, 0)),
            pl.BlockSpec((None, Cin, L), lambda n, t: (n, 0, t)),
        ],
        out_specs=(
            pl.BlockSpec((Cout, 1), lambda n, t: (0, 0)),
            pl.BlockSpec((Cout, 1), lambda n, t: (0, 0)),
        ),
        compiler_params=pltpu.CompilerParams(
            dimension_semantics=("arbitrary", "arbitrary")),
    )(w, x3)

    # Tiny (Cout,) finalize in plain JAX: fold BN into scale/shift.
    cnt = jnp.float32(N * HW)
    mean = s / cnt
    var = jnp.maximum(ssq / cnt - mean * mean, 0.0)      # biased var (PyTorch BN)
    inv_std = jax.lax.rsqrt(var + _BN_EPS)
    scale = bn_gamma.reshape(Cout, 1).astype(jnp.float32) * inv_std
    shift = bn_beta.reshape(Cout, 1).astype(jnp.float32) - mean * scale
    # conv_bias intentionally unused: y+b has b removed by BN mean subtraction.
    wb = jnp.concatenate([w * scale, shift], axis=1)     # (Cout, Cin+1)

    # Pass 2: conv + fused BN affine + ReLU, fully parallel over (N, HW tiles).
    out = pl.pallas_call(
        _apply_kernel,
        out_shape=jax.ShapeDtypeStruct((N, Cout, HW), jnp.float32),
        grid=(N, T),
        in_specs=[
            pl.BlockSpec((Cout, Cin + 1), lambda n, t: (0, 0)),
            pl.BlockSpec((None, Cin, L), lambda n, t: (n, 0, t)),
        ],
        out_specs=pl.BlockSpec((None, Cout, L), lambda n, t: (n, 0, t)),
        compiler_params=pltpu.CompilerParams(
            dimension_semantics=("parallel", "parallel")),
    )(wb, x3)

    return out.reshape(N, Cout, H, W)


def _reference(x, conv_weight, conv_bias, bn_gamma, bn_beta):
    """Pure-JAX reference matching the PyTorch training-mode forward."""
    Cout = conv_weight.shape[0]
    Cin = conv_weight.shape[1]
    w = conv_weight.reshape(Cout, Cin)
    y = jnp.einsum('oc,nchw->nohw', w, x) + conv_bias.reshape(1, Cout, 1, 1)
    mean = jnp.mean(y, axis=(0, 2, 3), keepdims=True)
    var = jnp.mean((y - mean) ** 2, axis=(0, 2, 3), keepdims=True)
    yh = (y - mean) * jax.lax.rsqrt(var + _BN_EPS)
    z = yh * bn_gamma.reshape(1, Cout, 1, 1) + bn_beta.reshape(1, Cout, 1, 1)
    return jnp.maximum(z, 0.0)


if __name__ == "__main__":
    N, Cin, H, W = 2, 4, 16, 16
    Cout = 8

    key = jax.random.PRNGKey(0)
    kx, kw, kb = jax.random.split(key, 3)

    x = jax.random.normal(kx, (N, Cin, H, W), dtype=jnp.float32)
    conv_weight = jax.random.normal(kw, (Cout, Cin, 1, 1), dtype=jnp.float32) * 0.1
    conv_bias = jax.random.normal(kb, (Cout,), dtype=jnp.float32) * 0.1
    bn_gamma = jnp.ones((Cout,), dtype=jnp.float32)   # PyTorch BN default
    bn_beta = jnp.zeros((Cout,), dtype=jnp.float32)   # PyTorch BN default

    out = base_conv_block(x, conv_weight, conv_bias, bn_gamma, bn_beta)
    jax.block_until_ready(out)

    assert out.shape == (N, Cout, H, W), out.shape
    ref = _reference(x, conv_weight, conv_bias, bn_gamma, bn_beta)
    assert jnp.allclose(out, ref, atol=1e-4, rtol=1e-4), \
        float(jnp.max(jnp.abs(out - ref)))

    print("KERNEL_OK")
</pallas_src>

<mosaic_0001>
module attributes {stable_mosaic.version = 11 : i64} {
  func.func @_stats_kernel(%arg0: i32, %arg1: i32, %arg2: memref<8x4xf32, #tpu.memory_space<vmem>>, %arg3: memref<1x4x256xf32, #tpu.memory_space<vmem>>, %arg4: memref<8x1xf32, #tpu.memory_space<vmem>>, %arg5: memref<8x1xf32, #tpu.memory_space<vmem>>) attributes {dimension_semantics = [#tpu.dimension_semantics<arbitrary>, #tpu.dimension_semantics<arbitrary>], iteration_bounds = array<i64: 2, 1>, scalar_prefetch = 0 : i64, scratch_operands = 0 : i64, tpu.core_type = #tpu.core_type<tc>, window_params = [{pipeline_mode = #tpu.pipeline_mode<synchronous>, transform_indices = @transform_0, window_bounds = array<i64: 8, 4>}, {transform_indices = @transform_1, window_bounds = array<i64: 1, 4, 256>}, {pipeline_mode = #tpu.pipeline_mode<synchronous>, transform_indices = @transform_2, window_bounds = array<i64: 8, 1>}, {pipeline_mode = #tpu.pipeline_mode<synchronous>, transform_indices = @transform_3, window_bounds = array<i64: 8, 1>}]} {
    %c0_i32 = arith.constant 0 : i32
    %0 = arith.cmpi eq, %arg0, %c0_i32 : i32
    %c0_i32_0 = arith.constant 0 : i32
    %1 = arith.cmpi eq, %arg1, %c0_i32_0 : i32
    %2 = arith.andi %0, %1 : i1
    %3 = arith.extui %2 : i1 to i32
    %c0_i32_1 = arith.constant 0 : i32
    %4 = arith.cmpi ne, %3, %c0_i32_1 : i32
    scf.if %4 {
      %cst_15 = arith.constant 0.000000e+00 : f32
      %42 = vector.broadcast %cst_15 : f32 to vector<8x1xf32>
      %c0_16 = arith.constant 0 : index
      %c0_17 = arith.constant 0 : index
      %43 = vector.load %arg4[%c0_16, %c0_17] : memref<8x1xf32, #tpu.memory_space<vmem>>, vector<8x1xf32>
      tpu.vector_store %arg4[%c0_16, %c0_17], %42 {strides = array<i32>} : memref<8x1xf32, #tpu.memory_space<vmem>>, vector<8x1xf32>,
      %cst_18 = arith.constant 0.000000e+00 : f32
      %44 = vector.broadcast %cst_18 : f32 to vector<8x1xf32>
      %c0_19 = arith.constant 0 : index
      %c0_20 = arith.constant 0 : index
      %45 = vector.load %arg5[%c0_19, %c0_20] : memref<8x1xf32, #tpu.memory_space<vmem>>, vector<8x1xf32>
      tpu.vector_store %arg5[%c0_19, %c0_20], %44 {strides = array<i32>} : memref<8x1xf32, #tpu.memory_space<vmem>>, vector<8x1xf32>,
    } else {
    }
    %c0 = arith.constant 0 : index
    %c0_2 = arith.constant 0 : index
    %5 = vector.load %arg2[%c0, %c0_2] : memref<8x4xf32, #tpu.memory_space<vmem>>, vector<8x4xf32>
    %c0_3 = arith.constant 0 : index
    %c0_4 = arith.constant 0 : index
    %c0_5 = arith.constant 0 : index
    %6 = vector.load %arg3[%c0_3, %c0_4, %c0_5] : memref<1x4x256xf32, #tpu.memory_space<vmem>>, vector<1x4x256xf32>
    %7 = vector.shape_cast %6 : vector<1x4x256xf32> to vector<4x256xf32>
    %8 = vector.extract_strided_slice %5 {offsets = [0, 0], sizes = [8, 1], strides = [1, 1]} : vector<8x4xf32> to vector<8x1xf32>
    %9 = vector.extract_strided_slice %7 {offsets = [0, 0], sizes = [1, 256], strides = [1, 1]} : vector<4x256xf32> to vector<1x256xf32>
    %10 = vector.broadcast %8 : vector<8x1xf32> to vector<8x256xf32>
    %11 = vector.broadcast %9 : vector<1x256xf32> to vector<8x256xf32>
    %12 = arith.mulf %10, %11 : vector<8x256xf32>
    %13 = vector.extract_strided_slice %5 {offsets = [0, 1], sizes = [8, 1], strides = [1, 1]} : vector<8x4xf32> to vector<8x1xf32>
    %14 = vector.extract_strided_slice %7 {offsets = [1, 0], sizes = [1, 256], strides = [1, 1]} : vector<4x256xf32> to vector<1x256xf32>
    %15 = vector.broadcast %13 : vector<8x1xf32> to vector<8x256xf32>
    %16 = vector.broadcast %14 : vector<1x256xf32> to vector<8x256xf32>
    %17 = arith.mulf %15, %16 : vector<8x256xf32>
    %18 = arith.addf %12, %17 : vector<8x256xf32>
    %19 = vector.extract_strided_slice %5 {offsets = [0, 2], sizes = [8, 1], strides = [1, 1]} : vector<8x4xf32> to vector<8x1xf32>
    %20 = vector.extract_strided_slice %7 {offsets = [2, 0], sizes = [1, 256], strides = [1, 1]} : vector<4x256xf32> to vector<1x256xf32>
    %21 = vector.broadcast %19 : vector<8x1xf32> to vector<8x256xf32>
    %22 = vector.broadcast %20 : vector<1x256xf32> to vector<8x256xf32>
    %23 = arith.mulf %21, %22 : vector<8x256xf32>
    %24 = arith.addf %18, %23 : vector<8x256xf32>
    %25 = vector.extract_strided_slice %5 {offsets = [0, 3], sizes = [8, 1], strides = [1, 1]} : vector<8x4xf32> to vector<8x1xf32>
    %26 = vector.extract_strided_slice %7 {offsets = [3, 0], sizes = [1, 256], strides = [1, 1]} : vector<4x256xf32> to vector<1x256xf32>
    %27 = vector.broadcast %25 : vector<8x1xf32> to vector<8x256xf32>
    %28 = vector.broadcast %26 : vector<1x256xf32> to vector<8x256xf32>
    %29 = arith.mulf %27, %28 : vector<8x256xf32>
    %30 = arith.addf %24, %29 : vector<8x256xf32>
    %c0_6 = arith.constant 0 : index
    %c0_7 = arith.constant 0 : index
    %31 = vector.load %arg4[%c0_6, %c0_7] : memref<8x1xf32, #tpu.memory_space<vmem>>, vector<8x1xf32>
    %cst = arith.constant dense<0.000000e+00> : vector<8xf32>
    %32 = vector.multi_reduction <add>, %30, %cst [1] : vector<8x256xf32> to vector<8xf32>
    %33 = vector.shape_cast %32 : vector<8xf32> to vector<8x1xf32>
    %34 = arith.addf %31, %33 : vector<8x1xf32>
    %c0_8 = arith.constant 0 : index
    %c0_9 = arith.constant 0 : index
    %35 = vector.load %arg4[%c0_8, %c0_9] : memref<8x1xf32, #tpu.memory_space<vmem>>, vector<8x1xf32>
    tpu.vector_store %arg4[%c0_8, %c0_9], %34 {strides = array<i32>} : memref<8x1xf32, #tpu.memory_space<vmem>>, vector<8x1xf32>,
    %c0_10 = arith.constant 0 : index
    %c0_11 = arith.constant 0 : index
    %36 = vector.load %arg5[%c0_10, %c0_11] : memref<8x1xf32, #tpu.memory_space<vmem>>, vector<8x1xf32>
    %37 = arith.mulf %30, %30 : vector<8x256xf32>
    %cst_12 = arith.constant dense<0.000000e+00> : vector<8xf32>
    %38 = vector.multi_reduction <add>, %37, %cst_12 [1] : vector<8x256xf32> to vector<8xf32>
    %39 = vector.shape_cast %38 : vector<8xf32> to vector<8x1xf32>
    %40 = arith.addf %36, %39 : vector<8x1xf32>
    %c0_13 = arith.constant 0 : index
    %c0_14 = arith.constant 0 : index
    %41 = vector.load %arg5[%c0_13, %c0_14] : memref<8x1xf32, #tpu.memory_space<vmem>>, vector<8x1xf32>
    tpu.vector_store %arg5[%c0_13, %c0_14], %40 {strides = array<i32>} : memref<8x1xf32, #tpu.memory_space<vmem>>, vector<8x1xf32>,
    return
  }
  func.func @transform_0(%arg0: i32, %arg1: i32) -> (i32, i32) {
    %c0_i32 = arith.constant 0 : i32
    %c0_i32_0 = arith.constant 0 : i32
    %c0_i32_1 = arith.constant 0 : i32
    return %c0_i32, %c0_i32_0 : i32, i32
  }
  func.func @transform_1(%arg0: i32, %arg1: i32) -> (i32, i32, i32) {
    %c0_i32 = arith.constant 0 : i32
    %c0_i32_0 = arith.constant 0 : i32
    return %arg0, %c0_i32, %arg1 : i32, i32, i32
  }
  func.func @transform_2(%arg0: i32, %arg1: i32) -> (i32, i32) {
    %c0_i32 = arith.constant 0 : i32
    %c0_i32_0 = arith.constant 0 : i32
    %c0_i32_1 = arith.constant 0 : i32
    return %c0_i32, %c0_i32_0 : i32, i32
  }
  func.func @transform_3(%arg0: i32, %arg1: i32) -> (i32, i32) {
    %c0_i32 = arith.constant 0 : i32
    %c0_i32_0 = arith.constant 0 : i32
    %c0_i32_1 = arith.constant 0 : i32
    return %c0_i32, %c0_i32_0 : i32, i32
  }
}

</mosaic_0001>

<bundles_post_ra>
// kernel: tpu_custom_call.1
= control target key start
LH: loop header
LB: loop body
LE: loop exit
PB: predicated region body
PF: predicated region fallthrough
CT: control target
= control target key end

     0   :  { %9 = vsyncpa [#allocation3], 0  ;;  %s707_s0 = inlined_call_operand.vmem [shape: f32[8,4], index: 0, kind: input, shape index: {}]   ;;  %s708_s1 = inlined_call_operand.hbm [shape: f32[2,4,256], index: 1, kind: input, shape index: {}]   ;;  %s709_s2 = inlined_call_operand.vmem [shape: f32[8,1], index: 2, kind: output, shape index: {0}]   ;;  %s710_s3 = inlined_call_operand.vmem [shape: f32[8,1], index: 3, kind: output, shape index: {1}]  }
   0x1   :  { %11 = vsyncpa [#allocation3 + $0x1], 0  ;;  %s562_s12 = smov 0   ;;  %s564_s13 = smov 0  }
   0x2   :  { %s566_s14 = smov 0   ;;  %s568_s15 = smov 0  }
   0x3   :  { %s570_s16 = smov 0   ;;  %s572_s17 = smov 0  }
   0x4 LB: > { %s376_s18 = sadd.s32 4294967295, %s534_s17   ;;  %s29_s19 = sadd.s32 1, %s530_s16  ;;  %s534_s17 = sphi %s572_s17, %s17_s17   ;;  %s530_s16 = sphi %s570_s16, %s720_s16   ;;  %s526_s15 = sphi %s568_s15, %s719_s15   ;;  %s522_s14 = sphi %s566_s14, %s718_s14   ;;  %s518_s13 = sphi %s564_s13, %s717_s13   ;;  %s514_s12 = sphi %s562_s12, %s716_s12  }
   0x5   : > { %p31_p0 = scmp.ge.s32.totalorder %s29_s19, 2  ;;  %s59_s20 = sadd.s32 1, %s522_s14 }
   0x6   : > { %p66_p1 = scmp.ne.s32.totalorder %s522_s14, %s518_s13  ;;  %p67_p2 = scmp.eq.s32.totalorder %s534_s17, 0 }
   0x7   : > { %s722_s19 = smov (%p31_p0, %s29_s19), 0  ;;  %p72_p4 = scmp.ne.s32.totalorder %s518_s13, %s514_s12 }
   0x8   : > { %p598_p3 = por %p67_p2, %p66_p1  ;;  %s54_s22 = ssub.s32 %s530_s16, %s722_s19 }
   0x9   : > { %p73_p5 = scmp.eq.s32.totalorder %s376_s18, 0  ;;  %p57_p6 = scmp.eq.s32.totalorder %s54_s22, 0 }
   0xa   : > { %p395_p8 = scmp.lt.s32.totalorder %s534_s17, 2  ;;  %s141_s25 = sand.u32 1, %s522_s14  }
   0xb   : > { %p605_p7 = por %p73_p5, %p72_p4  ;;  %s387_s26 = sshll.u32 %s530_s16, 7 }
   0xc   : > { %s611_s24 = scalar_select %p57_p6, %s522_s14, %s59_s20  }
   0xd   : > { %s379_s27 = sshll.u32 %s141_s25, 3  ;;  %s618_s30 = scalar_lea.hbm %s708_s1, %s387_s26 }
   0xe   : > { %s145_s4 = scalar_lea.vmem [#allocation2], %s379_s27  ;;  %p622_p9 = pnand %p395_p8, %p598_p3 }
   0xf   : > { %s155_s5 = sshll.u32 %s145_s4, 4  ;;  %s142_s7 = scalar_lea.sflag [#allocation3], %s141_s25  ;;  %s626_s5 = int_to_ptr.vmem [resolvable:$true] %s155_s5 }
  0x10   : > { %s454_s8 = scalar_lea.hbm %s618_s30, 128  ;;  %p456_p13 = pneg %p622_p9 }
  0x11   : > { %p455_p12 = scmp.ne.s32.totalorder %s618_s30, %s454_s8  ;;  %s459_s11 = scalar_lea.hbm %s708_s1, 256 }
  0x12   : > { %p460_p2 = scmp.lt.u32.totalorder %s618_s30, %s708_s1  ;;  %p461_p3 = scmp.lt.u32.totalorder %s459_s11, %s454_s8 }
  0x13   : > { %p457_p0 = pnand %p456_p13, %p455_p12  ;;  %p463_p5 = scmp.lt.u32.totalorder %s454_s8, %s618_s30 }
  0x14   : > { %p462_p4 = por %p461_p3, %p460_p2 }
  0x15   : > { %p458_p1 = pneg %p457_p0 }
  0x16   : > { %p464_p6 = por %p463_p5, %p462_p4 }
  0x18   : > { %p465_p8 = pnand %p464_p6, %p458_p1 }
  0x1a   : > { %468 = shalt.err (!%p465_p8)
}
  0x1b   : > { %s469_s20 = scalar_lea.vmem %s626_s5, 128  ;;  %s536_s21 = smov [#allocation2]  }
  0x1c   : > { %p470_p12 = scmp.ne.s32.totalorder %s626_s5, %s469_s20  ;;  %s474_s22 = sshll.u32 %s536_s21, 4  ;;  %s475_s22 = int_to_ptr.vmem [resolvable:$false] %s474_s22 }
  0x1d   : > { %s476_s25 = scalar_lea.vmem %s475_s22, 256  ;;  %p477_p11 = scmp.lt.s32.totalorder %s626_s5, %s475_s22 }
  0x1e   : > { %p472_p0 = pnand %p470_p12, %p456_p13  ;;  %p478_p2 = scmp.lt.s32.totalorder %s476_s25, %s469_s20 }
  0x20   : > { %p473_p10 = pneg %p472_p0  ;;  %p479_p3 = por %p478_p2, %p477_p11 }
  0x22   : > { %p480_p4 = pnand %p479_p3, %p473_p10 }
  0x24   : > { %483 = shalt.err (!%p480_p4)
}
  0x25   : > { %394 = dma.hbm_to_vmem [thread:$0]  (!%p622_p9), %s618_s30, 128, %s626_s5, %s142_s7  }
  0x26   : > { %p714_p1 = scmp.lt.s32.totalorder %s534_s17, 3  ;;  %p715_p5 = scmp.ge.s32.totalorder %s534_s17, 1 }
  0x28   : > { %p161_p13 = pnand %p715_p5, %p714_p1 }
  0x29   : > { %s166_s26 = sand.u32 (!%p161_p13), 1, %s518_s13  }
  0x2a   : > { %164 = sbr.rel (%p161_p13) target bundleno = 351 (0x15f), region = 28  ;;  %s660_s27 = sshll.u32 (!%p161_p13), %s166_s26, 3 }
  0x2b   : > { %s167_s28 = scalar_lea.sflag (!%p161_p13), [#allocation3], %s166_s26  ;;  %s170_s29 = scalar_lea.vmem (!%p161_p13), [#allocation2], %s660_s27 }
  0x31   : > { %509 = dma.done.wait (%p605_p7), %s167_s28, 128  }
  0x32   : > { %511 = vsyncadd (%p605_p7), %s167_s28, 4294967168  ;;  %p189_p10 = scmp.eq.s32.totalorder %s526_s15, 0 }
  0x33   : > { %vm195_vm0 = vcmask (%p189_p10), 7168   ;;  %v537_v0 = vmov (%p189_p10), 0.0  }
  0x34   : > { %194 = sbr.rel (!%p189_p10) target bundleno = 59 (0x3b), region = 36  ;;  %196 = vst.msk [vmem:[%s709_s2] sm:$0xff] (%p189_p10), %vm195_vm0, %v537_v0  ;;  %197 = vst.msk [vmem:[%s710_s3] sm:$0xff] (%p189_p10), %vm195_vm0, %v537_v0 }
  0x3b PF: > { %v198_v1 = vld [vmem:[%s707_s0] sm:$0xff]  ;;  %v538_v2 = vmov 0   ;;  %v539_v3 = vmov 2   ;;  %v540_v4 = vmov 1   ;;  %v541_v5 = vmov 3  }
  0x3c   : > { %449 = vset.pattern.permute.xlu0 %v538_v2  ;;  %451 = vset.pattern.permute.xlu1 %v539_v3  ;;  %v206_v6 = vlaneseq  ;;  %v199_v12 = vld [vmem:[%s170_s29] sm:$0xff]  ;;  %vm309_vm1 = vcmask 7168  }
  0x3d   : > { %202 = vperm.xlu0 %449, %v198_v1   ;;  %253 = vperm.xlu1 %451, %v198_v1   ;;  %v304_v55 = vld [vmem:[%s709_s2] sm:$0xff] }
  0x3e   : > { %v207_v7 = vshrl.u32 %v206_v6, 7  ;;  %v311_v57 = vld [vmem:[%s710_s3] sm:$0xff] }
  0x40   : > { %v208_v8 = vsub.s32 0, %v207_v7  ;;  %v212_v9 = vsub.s32 4, %v207_v7  ;;  %v232_v10 = vsub.s32 1, %v207_v7  ;;  %v236_v11 = vsub.s32 5, %v207_v7 }
  0x41   : > { %450 = vset.pattern.permute.xlu0 %v540_v4  ;;  %452 = vset.pattern.permute.xlu1 %v541_v5  ;;  %v258_v13 = vsub.s32 2, %v207_v7  ;;  %v262_v14 = vsub.s32 6, %v207_v7  ;;  %v284_v15 = vsub.s32 3, %v207_v7  ;;  %v288_v16 = vsub.s32 7, %v207_v7 }
  0x42   : > { %227 = vperm.xlu0 %450, %v198_v1   ;;  %279 = vperm.xlu1 %452, %v198_v1   ;;  %v209_v17 = vrot.slane %v199_v12, %v208_v8  ;;  %v213_v18 = vrot.slane %v199_v12, %v212_v9  ;;  %v233_v19 = vrot.slane %v199_v12, %v232_v10 }
  0x43   : > { %v237_v20 = vrot.slane %v199_v12, %v236_v11  ;;  %v259_v21 = vrot.slane %v199_v12, %v258_v13  ;;  %v263_v22 = vrot.slane %v199_v12, %v262_v14  ;;  %v285_v25 = vrot.slane %v199_v12, %v284_v15 }
  0x44   : > { %v289_v26 = vrot.slane %v199_v12, %v288_v16  ;;  %v219_v27 = vrot.slane %v209_v17, %v208_v8  ;;  %v223_v28 = vrot.slane %v213_v18, %v208_v8  ;;  %v243_v29 = vrot.slane %v233_v19, %v232_v10 }
  0x45   : > { %v247_v30 = vrot.slane %v237_v20, %v232_v10  ;;  %v269_v31 = vrot.slane %v259_v21, %v258_v13  ;;  %v273_v32 = vrot.slane %v263_v22, %v258_v13  ;;  %v295_v33 = vrot.slane %v285_v25, %v284_v15 }
  0x46   : > { %453 = vset.pattern.permute.xlu0 %v541_v5  ;;  %v299_v34 = vrot.slane %v289_v26, %v284_v15 }
  0xbc   : > { %v203_v23 = vpop.permute.xlu0 %202  ;;  %v254_v24 = vpop.permute.xlu1 %253 }
  0xbd   : > { %v224_v37 = vmul.f32 %v219_v27, %v203_v23  ;;  %v225_v38 = vmul.f32 %v223_v28, %v203_v23  ;;  %v274_v41 = vmul.f32 %v269_v31, %v254_v24  ;;  %v275_v42 = vmul.f32 %v273_v32, %v254_v24 }
  0xc1   : > { %v228_v35 = vpop.permute.xlu0 %227  ;;  %v280_v36 = vpop.permute.xlu1 %279 }
  0xc2   : > { %v248_v39 = vmul.f32 %v243_v29, %v228_v35  ;;  %v249_v40 = vmul.f32 %v247_v30, %v228_v35  ;;  %v300_v45 = vmul.f32 %v295_v33, %v280_v36  ;;  %v301_v46 = vmul.f32 %v299_v34, %v280_v36 }
  0xc4   : > { %v250_v43 = vadd.f32 %v248_v39, %v224_v37  ;;  %v251_v44 = vadd.f32 %v249_v40, %v225_v38 }
  0xc6   : > { %v276_v47 = vadd.f32 %v274_v41, %v250_v43  ;;  %v277_v48 = vadd.f32 %v275_v42, %v251_v44 }
  0xc8   : > { %v302_v49 = vadd.f32 %v300_v45, %v276_v47  ;;  %v303_v50 = vadd.f32 %v301_v46, %v277_v48 }
  0xca   : > { %v305_v51 = vadd.f32 %v303_v50, %v302_v49  ;;  %v312_v52 = vmul.f32 %v302_v49, %v302_v49  ;;  %v313_v53 = vmul.f32 %v303_v50, %v303_v50 }
  0xcc   : > { %306 = vadd.xlane.f32.xlu1 %v305_v51  ;;  %v314_v54 = vadd.f32 %v313_v53, %v312_v52 }
  0xce   : > { %315 = vadd.xlane.f32.xlu0 %v314_v54 }
 0x159   : > { %v307_v56 = vpop.xlane.xlu1 %306 }
 0x15a   : > { %v308_v58 = vadd.f32 %v307_v56, %v304_v55 }
 0x15b   : > { %v316_v59 = vpop.xlane.xlu0 %315 }
 0x15c   : > { %310 = vst.msk [vmem:[%s709_s2] sm:$0xff] %vm309_vm1, %v308_v58  ;;  %v317_v60 = vadd.f32 %v316_v59, %v311_v57 }
 0x15e   : > { %318 = vst.msk [vmem:[%s710_s3] sm:$0xff] %vm309_vm1, %v317_v60 }
 0x15f PF: > { %s17_s17 = sadd.s32 1, %s534_s17   ;;  %s716_s12 = smov %s518_s13 }
 0x160   : > { %p14_p7 = scmp.ge.s32.totalorder %s17_s17, 4   ;;  %s717_s13 = smov %s522_s14 }
 0x161   : > { %s718_s14 = smov %s611_s24  ;;  %s719_s15 = smov %s530_s16 }
 0x162   : > { %s720_s16 = smov %s722_s19  ;;  %16 = sbr.rel (!%p14_p7) target bundleno = 4 (0x4), region = 76 }
 0x169   :  { %336 = vsyncpa [#allocation3], 1 }
 0x16a   :  { %338 = vsyncpa [#allocation3 + $0x1], 1 }

</bundles_post_ra>
